<compile_context>
chip_gen: v7x
topology: tpu7x:2x2x1
jax: 0.10.0
libtpu: 0.0.40
codegen_flags: <defaults>
</compile_context>

<pallas_src>
import functools
import math

import numpy as np
import jax
import jax.numpy as jnp
from jax.experimental import pallas as pl
from jax.experimental.pallas import tpu as pltpu

LN_EPS = 1e-5
# MXU operand dtype.  bf16 operands + f32 accumulation is the fast path on
# v6e/v7x (bf16-native MXU) and also fine on v5e.  All LayerNorm / bias / ReLU
# math stays f32.  Flip to jnp.float32 for bit-tight comparisons.
MATMUL_DTYPE = jnp.bfloat16

_LEAD = 8  # sublane-aligned lead halo in the deinterleaved scratches


# ---------------------------------------------------------------------------
# Static geometry of the even/odd padded-row groups for a stride-2 conv.
# Padded row j = 2*m + g (g = parity).  Tap k reads padded rows 2*t + k, i.e.
# group g = k % 2, group rows [k//2, k//2 + t_out)  ->  contiguous slices.
# ---------------------------------------------------------------------------
def _parity_geom(pad, t_prev, t_out, K):
    groups = []
    for g in (0, 1):
        m0 = (pad - g + 1) // 2                 # first in-range group row
        h_start = 2 * m0 + g - pad              # first source activation row
        n = len(range(h_start, t_prev, 2))      # interior rows
        taps = [k for k in range(K) if k % 2 == g]
        max_a = max([k // 2 for k in taps], default=0)
        tail = max(0, max_a + t_out - m0 - n)   # trailing zero rows needed
        groups.append(dict(m0=m0, h_start=h_start, n=n, tail=tail))
    return groups


# ---------------------------------------------------------------------------
# Fused kernel: depth x (conv -> LayerNorm -> ReLU) + adaptive average pool.
# One grid step processes `bb` batch elements, folded into the matmul M dim.
# ---------------------------------------------------------------------------
def _fused_frontend_kernel(*refs, depth, K, pad, t_outs, chans, t_pool, bb,
                           eps, md):
    x_ref = refs[0]                              # (bb*t_outs[0], K*Cin)  md
    w_refs = [refs[1 + 2 * i] for i in range(depth)]
    p_refs = [refs[2 + 2 * i] for i in range(depth)]   # (3, C): b/gamma/beta
    pool_ref = refs[1 + 2 * depth]               # (T_pool, t_last)       f32
    o_ref = refs[2 + 2 * depth]                  # (bb*T_pool, C_last)    f32
    scratch_it = iter(refs[3 + 2 * depth:])

    def bias_ln_relu(acc, p_ref):
        prm = p_ref[...]                         # (3, C) f32
        acc = acc + prm[0:1, :]                  # conv bias
        mean = jnp.mean(acc, axis=-1, keepdims=True)
        d = acc - mean                           # two-pass variance (robust)
        var = jnp.mean(d * d, axis=-1, keepdims=True)
        h = d * jax.lax.rsqrt(var + eps)
        h = h * prm[1:2, :] + prm[2:3, :]
        return jnp.maximum(h, 0.0)               # f32

    # ---- layer 0: one MXU matmul for the whole block (batch folded into M).
    acc = jnp.dot(x_ref[...], w_refs[0][...],
                  preferred_element_type=jnp.float32)
    h = bias_ln_relu(acc, p_refs[0])             # (bb*t_outs[0], C0)
    # NOTE: when depth >= 2, rows of h are parity-permuted per batch
    # (even output positions first) — set up by the wrapper so that layer 1's
    # stride-2 taps become contiguous slices.  LayerNorm is per-row, so this
    # is transparent.

    # ---- layers 1..depth-1: stride-2 conv -> LN -> ReLU, staying in VMEM.
    for i in range(1, depth):
        t_prev, t_out = t_outs[i - 1], t_outs[i]
        c_prev = chans[i - 1]
        geom = _parity_geom(pad, t_prev, t_out, K)
        grp = [next(scratch_it), next(scratch_it)]    # even / odd padded rows
        mid = next(scratch_it) if i >= 2 else None

        if mid is not None:
            mid[...] = h                              # natural row order

        n_even = len(range(0, t_prev, 2))
        lhs_rows = []
        for b in range(bb):
            for g in (0, 1):
                gm, scr = geom[g], grp[g]
                # Zero only the halos (8 aligned lead rows + tiny tail),
                # never the whole scratch.
                scr[b, pl.ds(0, _LEAD), :] = jnp.zeros((_LEAD, c_prev),
                                                       jnp.float32)
                if gm["tail"] > 0:
                    scr[b, pl.ds(_LEAD + gm["n"], gm["tail"]), :] = (
                        jnp.zeros((gm["tail"], c_prev), jnp.float32))
                if i == 1:
                    # Layer-0 rows were pre-permuted in the wrapper, so the
                    # interior is one contiguous slice of h.
                    off = b * t_prev + (0 if gm["h_start"] == 0 else n_even)
                    scr[b, pl.ds(_LEAD, gm["n"]), :] = h[off:off + gm["n"], :]
                else:
                    # Generic path (depth > 2): deinterleave ONCE with a
                    # strided read instead of K strided tap loads.
                    scr[b, pl.ds(_LEAD, gm["n"]), :] = mid[
                        pl.ds(b * t_prev + gm["h_start"], gm["n"], stride=2), :]
            # K contiguous tap reads -> lane concat -> (t_out, K*C_prev).
            cols = []
            for k in range(K):
                gm = geom[k % 2]
                start = _LEAD - gm["m0"] + k // 2
                cols.append(grp[k % 2][b, pl.ds(start, t_out), :])
            lhs_rows.append(jnp.concatenate(cols, axis=-1))
        lhs = lhs_rows[0] if bb == 1 else jnp.concatenate(lhs_rows, axis=0)
        acc = jnp.dot(lhs.astype(md), w_refs[i][...],
                      preferred_element_type=jnp.float32)
        h = bias_ln_relu(acc, p_refs[i])              # natural row order

    # ---- adaptive avg pool: (T_pool, t_last) @ (t_last, C_last) per batch.
    # TODO(synk): for c_last < 128 the (T_pool, c_last) store is a masked vst;
    # a lane-dense flattened store would need an in-kernel relayout — skipped.
    t_last = t_outs[-1]
    for b in range(bb):
        pooled = jnp.dot(pool_ref[...], h[b * t_last:(b + 1) * t_last, :],
                         preferred_element_type=jnp.float32)
        o_ref[pl.ds(b * t_pool, t_pool), :] = pooled.astype(o_ref.dtype)


# ---------------------------------------------------------------------------
# Glue
# ---------------------------------------------------------------------------
def _adaptive_pool_matrix(t_in, t_out):
    """Exact PyTorch AdaptiveAvgPool1d window semantics as a [t_in, t_out] matrix."""
    p = np.zeros((t_in, t_out), np.float32)
    for i in range(t_out):
        s = (i * t_in) // t_out
        e = math.ceil((i + 1) * t_in / t_out)
        p[s:e, i] = 1.0 / (e - s)
    return jnp.asarray(p)


def frontend_cnn_forward(x_bct, params, *, temporal_dim, num_blocks=None):
    """x_bct: [B, in_channels, T] -> [B, out_channels, temporal_dim]."""
    layers = params["layers"]
    depth = len(layers)
    B, Cin, T = x_bct.shape
    K = layers[0]["w"].shape[0]
    assert K % 2 == 1, "odd kernel_size assumed ('same' conv geometry)"
    pad = K // 2
    assert (pad + 1) // 2 <= _LEAD

    # Static layer geometry.
    t_outs, chans = [], []
    t_in = T
    for i, layer in enumerate(layers):
        stride = 1 if i == 0 else 2
        t_outs.append((t_in + 2 * pad - K) // stride + 1)
        chans.append(layer["w"].shape[-1])
        t_in = t_outs[-1]
    t0, t_last, c_last = t_outs[0], t_outs[-1], chans[-1]

    # Grid: 2 "parallel" blocks keep both v7x TensorCores busy; on single-TC
    # v5e/v6e this costs one extra ~0.35us step but still folds B/2 batches
    # into every matmul's M dimension.  Pass num_blocks=1 to fully collapse.
    if num_blocks is None:
        num_blocks = 2 if (B >= 2 and B % 2 == 0) else 1
    assert B % num_blocks == 0
    bb = B // num_blocks

    # Layer-0 im2col in XLA glue: lane-contiguous [B*t0, K*Cin] lhs slab.
    xt = jnp.transpose(x_bct, (0, 2, 1))                      # [B, T, Cin]
    xp = jnp.pad(xt, ((0, 0), (pad, pad), (0, 0)))
    x_im2col = jnp.concatenate([xp[:, k:k + t0, :] for k in range(K)], axis=-1)
    if depth >= 2:
        # Pre-deinterleave layer-0 OUTPUT rows (even t first, then odd t) so
        # layer 1's stride-2 taps are contiguous VMEM slices in the kernel.
        perm = np.concatenate([np.arange(0, t0, 2), np.arange(1, t0, 2)])
        x_im2col = x_im2col[:, perm, :]
    x2d = x_im2col.reshape(B * t0, K * Cin).astype(MATMUL_DTYPE)

    p_t = _adaptive_pool_matrix(t_last, temporal_dim).T       # (T_pool, t_last)

    inputs = [x2d]
    in_specs = [pl.BlockSpec((bb * t0, K * Cin), lambda g: (g, 0))]
    for layer in layers:
        k_, cin_i, cout_i = layer["w"].shape
        w2d = layer["w"].reshape(k_ * cin_i, cout_i).astype(MATMUL_DTYPE)
        prm = jnp.stack([layer["b"], layer["gamma"], layer["beta"]])  # (3, C)
        inputs += [w2d, prm]
        in_specs += [pl.BlockSpec((k_ * cin_i, cout_i), lambda g: (0, 0)),
                     pl.BlockSpec((3, cout_i), lambda g: (0, 0))]
    inputs.append(p_t)
    in_specs.append(pl.BlockSpec((temporal_dim, t_last), lambda g: (0, 0)))

    # Scratch: per hidden layer two small deinterleaved activation buffers
    # (8-row aligned lead halo + interior + tiny tail); a contiguous staging
    # buffer only for depth > 2.  All intermediates stay in VMEM.
    scratch_shapes = []
    for i in range(1, depth):
        geom = _parity_geom(pad, t_outs[i - 1], t_outs[i], K)
        for g in (0, 1):
            rows = _LEAD + geom[g]["n"] + geom[g]["tail"]
            scratch_shapes.append(
                pltpu.VMEM((bb, rows, chans[i - 1]), jnp.float32))
        if i >= 2:
            scratch_shapes.append(
                pltpu.VMEM((bb * t_outs[i - 1], chans[i - 1]), jnp.float32))

    kernel = functools.partial(
        _fused_frontend_kernel, depth=depth, K=K, pad=pad,
        t_outs=tuple(t_outs), chans=tuple(chans), t_pool=temporal_dim,
        bb=bb, eps=LN_EPS, md=MATMUL_DTYPE)

    # Advisory cost estimate so XLA can overlap the surrounding glue ops.
    flops, cin_i = 0, Cin
    for i in range(depth):
        flops += 2 * B * t_outs[i] * (K * cin_i) * chans[i]
        cin_i = chans[i]
    flops += 2 * B * temporal_dim * t_last * c_last
    itemsize = 2 if MATMUL_DTYPE == jnp.bfloat16 else 4
    bytes_accessed = x2d.size * itemsize + p_t.size * 4 \
        + B * temporal_dim * c_last * 4
    for layer in layers:
        k_, ci, co = layer["w"].shape
        bytes_accessed += k_ * ci * co * itemsize + 3 * co * 4
    cost = pl.CostEstimate(flops=int(flops),
                           transcendentals=int(B * sum(t_outs)),
                           bytes_accessed=int(bytes_accessed))

    # TODO(synk): for long audio sequences add a time-tile grid axis with a
    # receptive-field halo and set vmem_limit_bytes explicitly — tiles must be
    # re-derived for v7x's 64 MiB VMEM (sizes that fit v6e's 128 MiB won't).
    out2d = pl.pallas_call(
        kernel,
        out_shape=jax.ShapeDtypeStruct((B * temporal_dim, c_last), jnp.float32),
        grid_spec=pltpu.PrefetchScalarGridSpec(
            num_scalar_prefetch=0,
            grid=(num_blocks,),
            in_specs=in_specs,
            out_specs=pl.BlockSpec((bb * temporal_dim, c_last),
                                   lambda g: (g, 0)),
            scratch_shapes=scratch_shapes,
        ),
        compiler_params=pltpu.CompilerParams(
            dimension_semantics=("parallel",)),
        cost_estimate=cost,
    )(*inputs)

    # [B*T_pool, C] -> PyTorch layout [B, C, T_pool].
    return jnp.transpose(out2d.reshape(B, temporal_dim, c_last), (0, 2, 1))


# ---------------------------------------------------------------------------
# Deterministic parameter init (synthetic weights, not a checkpoint)
# ---------------------------------------------------------------------------
def init_params(key, in_channels, base_filters, depth, kernel_size):
    layers = []
    cin = in_channels
    for i in range(depth):
        cout = base_filters * 2 ** i
        key, k1, k2, k3, k4 = jax.random.split(key, 5)
        fan_in = cin * kernel_size
        layers.append(dict(
            # w[k, cin, cout] == torch_conv.weight[cout, cin, k]
            w=jax.random.normal(k1, (kernel_size, cin, cout),
                                jnp.float32) / math.sqrt(fan_in),
            b=0.1 * jax.random.normal(k2, (cout,), jnp.float32),
            gamma=1.0 + 0.1 * jax.random.normal(k3, (cout,), jnp.float32),
            beta=0.1 * jax.random.normal(k4, (cout,), jnp.float32),
        ))
        cin = cout
    return {"layers": layers}


# ---------------------------------------------------------------------------
# Pure-JAX reference (mirrors the PyTorch forward) for a correctness check
# ---------------------------------------------------------------------------
def reference_forward(x_bct, params, *, kernel_size, temporal_dim):
    h = jnp.transpose(x_bct, (0, 2, 1))          # [B, T, C]
    K = kernel_size
    pad = K // 2
    for i, layer in enumerate(params["layers"]):
        stride = 1 if i == 0 else 2
        B, T_in, _ = h.shape
        t_out = (T_in + 2 * pad - K) // stride + 1
        hp = jnp.pad(h, ((0, 0), (pad, pad), (0, 0)))
        taps = jnp.stack(
            [hp[:, k:k + stride * (t_out - 1) + 1:stride, :] for k in range(K)],
            axis=0)                              # [K, B, t_out, Cin]
        conv = jnp.einsum("kbtc,kcd->btd", taps, layer["w"]) + layer["b"]
        mean = jnp.mean(conv, axis=-1, keepdims=True)
        var = jnp.mean((conv - mean) ** 2, axis=-1, keepdims=True)
        hln = (conv - mean) / jnp.sqrt(var + LN_EPS) * layer["gamma"] \
            + layer["beta"]
        h = jnp.maximum(hln, 0.0)
    B, T, C = h.shape
    p = _adaptive_pool_matrix(T, temporal_dim)
    return jnp.einsum("btc,to->bco", h, p)       # [B, C, temporal_dim]


# ---------------------------------------------------------------------------
if __name__ == "__main__":
    B, in_channels, T = 2, 3, 64
    base_filters, depth, kernel_size, temporal_dim = 16, 2, 7, 16

    key = jax.random.PRNGKey(0)
    kx, kp = jax.random.split(key)
    x = jax.random.normal(kx, (B, in_channels, T), jnp.float32)
    params = init_params(kp, in_channels, base_filters, depth, kernel_size)

    out = frontend_cnn_forward(x, params, temporal_dim=temporal_dim)
    out = jax.block_until_ready(out)

    ref = reference_forward(x, params, kernel_size=kernel_size,
                            temporal_dim=temporal_dim)
    assert out.shape == (B, base_filters * 2 ** (depth - 1), temporal_dim)
    # bf16 MXU operands with f32 accumulation -> relaxed tolerance vs the
    # pure-f32 reference (use 2e-4 when MATMUL_DTYPE == float32).
    tol = 3e-2 if MATMUL_DTYPE == jnp.bfloat16 else 2e-4
    np.testing.assert_allclose(np.asarray(out), np.asarray(ref),
                               rtol=tol, atol=tol)
    print("KERNEL_OK")
</pallas_src>

<mosaic_0001>
module attributes {stable_mosaic.version = 11 : i64} {
  func.func @_fused_frontend_kernel(%arg0: i32, %arg1: memref<64x21xbf16, #tpu.memory_space<vmem>>, %arg2: memref<21x16xbf16, #tpu.memory_space<vmem>>, %arg3: memref<3x16xf32, #tpu.memory_space<vmem>>, %arg4: memref<112x32xbf16, #tpu.memory_space<vmem>>, %arg5: memref<3x32xf32, #tpu.memory_space<vmem>>, %arg6: memref<16x32xf32, #tpu.memory_space<vmem>>, %arg7: memref<16x32xf32, #tpu.memory_space<vmem>>, %arg8: memref<1x41x16xf32, #tpu.memory_space<vmem>>, %arg9: memref<1x41x16xf32, #tpu.memory_space<vmem>>) attributes {dimension_semantics = [#tpu.dimension_semantics<parallel>], iteration_bounds = array<i64: 2>, scalar_prefetch = 0 : i64, scratch_operands = 2 : i64, tpu.core_type = #tpu.core_type<tc>, window_params = [{transform_indices = @transform_0, window_bounds = array<i64: 64, 21>}, {pipeline_mode = #tpu.pipeline_mode<synchronous>, transform_indices = @transform_1, window_bounds = array<i64: 21, 16>}, {pipeline_mode = #tpu.pipeline_mode<synchronous>, transform_indices = @transform_2, window_bounds = array<i64: 3, 16>}, {pipeline_mode = #tpu.pipeline_mode<synchronous>, transform_indices = @transform_3, window_bounds = array<i64: 112, 32>}, {pipeline_mode = #tpu.pipeline_mode<synchronous>, transform_indices = @transform_4, window_bounds = array<i64: 3, 32>}, {pipeline_mode = #tpu.pipeline_mode<synchronous>, transform_indices = @transform_5, window_bounds = array<i64: 16, 32>}, {transform_indices = @transform_6, window_bounds = array<i64: 16, 32>}]} {
    %c0 = arith.constant 0 : index
    %c0_0 = arith.constant 0 : index
    %0 = vector.load %arg1[%c0, %c0_0] : memref<64x21xbf16, #tpu.memory_space<vmem>>, vector<64x21xbf16>
    %c0_1 = arith.constant 0 : index
    %c0_2 = arith.constant 0 : index
    %1 = vector.load %arg2[%c0_1, %c0_2] : memref<21x16xbf16, #tpu.memory_space<vmem>>, vector<21x16xbf16>
    %cst = arith.constant dense<0.000000e+00> : vector<64x16xf32>
    %2 = tpu.matmul %0, %1, %cst {dimension_numbers = #tpu.dot_dimension_numbers<[1], [0], [0], [1], [0, 0, 1, 1], [], []>} : vector<64x21xbf16>, vector<21x16xbf16>, vector<64x16xf32> -> vector<64x16xf32>
    %c0_3 = arith.constant 0 : index
    %c0_4 = arith.constant 0 : index
    %3 = vector.load %arg3[%c0_3, %c0_4] : memref<3x16xf32, #tpu.memory_space<vmem>>, vector<3x16xf32>
    %4 = vector.extract_strided_slice %3 {offsets = [0, 0], sizes = [1, 16], strides = [1, 1]} : vector<3x16xf32> to vector<1x16xf32>
    %5 = vector.broadcast %4 : vector<1x16xf32> to vector<64x16xf32>
    %6 = arith.addf %2, %5 : vector<64x16xf32>
    %cst_5 = arith.constant dense<0.000000e+00> : vector<64xf32>
    %7 = vector.multi_reduction <add>, %6, %cst_5 [1] : vector<64x16xf32> to vector<64xf32>
    %8 = vector.shape_cast %7 : vector<64xf32> to vector<64x1xf32>
    %cst_6 = arith.constant 1.600000e+01 : f32
    %9 = vector.broadcast %cst_6 : f32 to vector<64x1xf32>
    %10 = arith.divf %8, %9 : vector<64x1xf32>
    %11 = vector.broadcast %10 : vector<64x1xf32> to vector<64x16xf32>
    %12 = arith.subf %6, %11 : vector<64x16xf32>
    %13 = arith.mulf %12, %12 : vector<64x16xf32>
    %cst_7 = arith.constant dense<0.000000e+00> : vector<64xf32>
    %14 = vector.multi_reduction <add>, %13, %cst_7 [1] : vector<64x16xf32> to vector<64xf32>
    %15 = vector.shape_cast %14 : vector<64xf32> to vector<64x1xf32>
    %cst_8 = arith.constant 1.600000e+01 : f32
    %16 = vector.broadcast %cst_8 : f32 to vector<64x1xf32>
    %17 = arith.divf %15, %16 : vector<64x1xf32>
    %cst_9 = arith.constant 9.99999974E-6 : f32
    %18 = vector.broadcast %cst_9 : f32 to vector<64x1xf32>
    %19 = arith.addf %17, %18 : vector<64x1xf32>
    %20 = math.rsqrt %19 : vector<64x1xf32>
    %21 = vector.broadcast %20 : vector<64x1xf32> to vector<64x16xf32>
    %22 = arith.mulf %12, %21 : vector<64x16xf32>
    %23 = vector.extract_strided_slice %3 {offsets = [1, 0], sizes = [1, 16], strides = [1, 1]} : vector<3x16xf32> to vector<1x16xf32>
    %24 = vector.broadcast %23 : vector<1x16xf32> to vector<64x16xf32>
    %25 = arith.mulf %22, %24 : vector<64x16xf32>
    %26 = vector.extract_strided_slice %3 {offsets = [2, 0], sizes = [1, 16], strides = [1, 1]} : vector<3x16xf32> to vector<1x16xf32>
    %27 = vector.broadcast %26 : vector<1x16xf32> to vector<64x16xf32>
    %28 = arith.addf %25, %27 : vector<64x16xf32>
    %cst_10 = arith.constant 0.000000e+00 : f32
    %29 = vector.broadcast %cst_10 : f32 to vector<64x16xf32>
    %30 = arith.maximumf %28, %29 : vector<64x16xf32>
    %cst_11 = arith.constant 0.000000e+00 : f32
    %31 = vector.broadcast %cst_11 : f32 to vector<8x16xf32>
    %c0_12 = arith.constant 0 : index
    %c0_13 = arith.constant 0 : index
    %c0_14 = arith.constant 0 : index
    %32 = vector.load %arg8[%c0_12, %c0_13, %c0_14] : memref<1x41x16xf32, #tpu.memory_space<vmem>>, vector<1x8x16xf32>
    %33 = vector.shape_cast %32 : vector<1x8x16xf32> to vector<8x16xf32>
    %34 = vector.shape_cast %31 : vector<8x16xf32> to vector<1x8x16xf32>
    tpu.vector_store %arg8[%c0_12, %c0_13, %c0_14], %34 {strides = array<i32>} : memref<1x41x16xf32, #tpu.memory_space<vmem>>, vector<1x8x16xf32>,
    %cst_15 = arith.constant 0.000000e+00 : f32
    %35 = vector.broadcast %cst_15 : f32 to vector<1x16xf32>
    %c0_16 = arith.constant 0 : index
    %c40 = arith.constant 40 : index
    %c0_17 = arith.constant 0 : index
    %36 = vector.load %arg8[%c0_16, %c40, %c0_17] : memref<1x41x16xf32, #tpu.memory_space<vmem>>, vector<1x1x16xf32>
    %37 = vector.shape_cast %36 : vector<1x1x16xf32> to vector<1x16xf32>
    %38 = vector.shape_cast %35 : vector<1x16xf32> to vector<1x1x16xf32>
    tpu.vector_store %arg8[%c0_16, %c40, %c0_17], %38 {strides = array<i32>} : memref<1x41x16xf32, #tpu.memory_space<vmem>>, vector<1x1x16xf32>,
    %39 = vector.extract_strided_slice %30 {offsets = [32, 0], sizes = [32, 16], strides = [1, 1]} : vector<64x16xf32> to vector<32x16xf32>
    %c0_18 = arith.constant 0 : index
    %c8 = arith.constant 8 : index
    %c0_19 = arith.constant 0 : index
    %40 = vector.load %arg8[%c0_18, %c8, %c0_19] : memref<1x41x16xf32, #tpu.memory_space<vmem>>, vector<1x32x16xf32>
    %41 = vector.shape_cast %40 : vector<1x32x16xf32> to vector<32x16xf32>
    %42 = vector.shape_cast %39 : vector<32x16xf32> to vector<1x32x16xf32>
    tpu.vector_store %arg8[%c0_18, %c8, %c0_19], %42 {strides = array<i32>} : memref<1x41x16xf32, #tpu.memory_space<vmem>>, vector<1x32x16xf32>,
    %cst_20 = arith.constant 0.000000e+00 : f32
    %43 = vector.broadcast %cst_20 : f32 to vector<8x16xf32>
    %c0_21 = arith.constant 0 : index
    %c0_22 = arith.constant 0 : index
    %c0_23 = arith.constant 0 : index
    %44 = vector.load %arg9[%c0_21, %c0_22, %c0_23] : memref<1x41x16xf32, #tpu.memory_space<vmem>>, vector<1x8x16xf32>
    %45 = vector.shape_cast %44 : vector<1x8x16xf32> to vector<8x16xf32>
    %46 = vector.shape_cast %43 : vector<8x16xf32> to vector<1x8x16xf32>
    tpu.vector_store %arg9[%c0_21, %c0_22, %c0_23], %46 {strides = array<i32>} : memref<1x41x16xf32, #tpu.memory_space<vmem>>, vector<1x8x16xf32>,
    %cst_24 = arith.constant 0.000000e+00 : f32
    %47 = vector.broadcast %cst_24 : f32 to vector<1x16xf32>
    %c0_25 = arith.constant 0 : index
    %c40_26 = arith.constant 40 : index
    %c0_27 = arith.constant 0 : index
    %48 = vector.load %arg9[%c0_25, %c40_26, %c0_27] : memref<1x41x16xf32, #tpu.memory_space<vmem>>, vector<1x1x16xf32>
    %49 = vector.shape_cast %48 : vector<1x1x16xf32> to vector<1x16xf32>
    %50 = vector.shape_cast %47 : vector<1x16xf32> to vector<1x1x16xf32>
    tpu.vector_store %arg9[%c0_25, %c40_26, %c0_27], %50 {strides = array<i32>} : memref<1x41x16xf32, #tpu.memory_space<vmem>>, vector<1x1x16xf32>,
    %51 = vector.extract_strided_slice %30 {offsets = [0, 0], sizes = [32, 16], strides = [1, 1]} : vector<64x16xf32> to vector<32x16xf32>
    %c0_28 = arith.constant 0 : index
    %c8_29 = arith.constant 8 : index
    %c0_30 = arith.constant 0 : index
    %52 = vector.load %arg9[%c0_28, %c8_29, %c0_30] : memref<1x41x16xf32, #tpu.memory_space<vmem>>, vector<1x32x16xf32>
    %53 = vector.shape_cast %52 : vector<1x32x16xf32> to vector<32x16xf32>
    %54 = vector.shape_cast %51 : vector<32x16xf32> to vector<1x32x16xf32>
    tpu.vector_store %arg9[%c0_28, %c8_29, %c0_30], %54 {strides = array<i32>} : memref<1x41x16xf32, #tpu.memory_space<vmem>>, vector<1x32x16xf32>,
    %c0_31 = arith.constant 0 : index
    %c6 = arith.constant 6 : index
    %c0_32 = arith.constant 0 : index
    %55 = vector.load %arg8[%c0_31, %c6, %c0_32] : memref<1x41x16xf32, #tpu.memory_space<vmem>>, vector<1x32x16xf32>
    %56 = vector.shape_cast %55 : vector<1x32x16xf32> to vector<32x16xf32>
    %c0_33 = arith.constant 0 : index
    %c7 = arith.constant 7 : index
    %c0_34 = arith.constant 0 : index
    %57 = vector.load %arg9[%c0_33, %c7, %c0_34] : memref<1x41x16xf32, #tpu.memory_space<vmem>>, vector<1x32x16xf32>
    %58 = vector.shape_cast %57 : vector<1x32x16xf32> to vector<32x16xf32>
    %c0_35 = arith.constant 0 : index
    %c7_36 = arith.constant 7 : index
    %c0_37 = arith.constant 0 : index
    %59 = vector.load %arg8[%c0_35, %c7_36, %c0_37] : memref<1x41x16xf32, #tpu.memory_space<vmem>>, vector<1x32x16xf32>
    %60 = vector.shape_cast %59 : vector<1x32x16xf32> to vector<32x16xf32>
    %c0_38 = arith.constant 0 : index
    %c8_39 = arith.constant 8 : index
    %c0_40 = arith.constant 0 : index
    %61 = vector.load %arg9[%c0_38, %c8_39, %c0_40] : memref<1x41x16xf32, #tpu.memory_space<vmem>>, vector<1x32x16xf32>
    %62 = vector.shape_cast %61 : vector<1x32x16xf32> to vector<32x16xf32>
    %c0_41 = arith.constant 0 : index
    %c8_42 = arith.constant 8 : index
    %c0_43 = arith.constant 0 : index
    %63 = vector.load %arg8[%c0_41, %c8_42, %c0_43] : memref<1x41x16xf32, #tpu.memory_space<vmem>>, vector<1x32x16xf32>
    %64 = vector.shape_cast %63 : vector<1x32x16xf32> to vector<32x16xf32>
    %c0_44 = arith.constant 0 : index
    %c9 = arith.constant 9 : index
    %c0_45 = arith.constant 0 : index
    %65 = vector.load %arg9[%c0_44, %c9, %c0_45] : memref<1x41x16xf32, #tpu.memory_space<vmem>>, vector<1x32x16xf32>
    %66 = vector.shape_cast %65 : vector<1x32x16xf32> to vector<32x16xf32>
    %c0_46 = arith.constant 0 : index
    %c9_47 = arith.constant 9 : index
    %c0_48 = arith.constant 0 : index
    %67 = vector.load %arg8[%c0_46, %c9_47, %c0_48] : memref<1x41x16xf32, #tpu.memory_space<vmem>>, vector<1x32x16xf32>
    %68 = vector.shape_cast %67 : vector<1x32x16xf32> to vector<32x16xf32>
    %69 = tpu.concatenate %56, %58, %60, %62, %64, %66, %68 in 1 : vector<32x16xf32>, vector<32x16xf32>, vector<32x16xf32>, vector<32x16xf32>, vector<32x16xf32>, vector<32x16xf32>, vector<32x16xf32> -> vector<32x112xf32>
    %70 = arith.truncf %69 : vector<32x112xf32> to vector<32x112xbf16>
    %c0_49 = arith.constant 0 : index
    %c0_50 = arith.constant 0 : index
    %71 = vector.load %arg4[%c0_49, %c0_50] : memref<112x32xbf16, #tpu.memory_space<vmem>>, vector<112x32xbf16>
    %cst_51 = arith.constant dense<0.000000e+00> : vector<32x32xf32>
    %72 = tpu.matmul %70, %71, %cst_51 {dimension_numbers = #tpu.dot_dimension_numbers<[1], [0], [0], [1], [0, 0, 1, 1], [], []>} : vector<32x112xbf16>, vector<112x32xbf16>, vector<32x32xf32> -> vector<32x32xf32>
    %c0_52 = arith.constant 0 : index
    %c0_53 = arith.constant 0 : index
    %73 = vector.load %arg5[%c0_52, %c0_53] : memref<3x32xf32, #tpu.memory_space<vmem>>, vector<3x32xf32>
    %74 = vector.extract_strided_slice %73 {offsets = [0, 0], sizes = [1, 32], strides = [1, 1]} : vector<3x32xf32> to vector<1x32xf32>
    %75 = vector.broadcast %74 : vector<1x32xf32> to vector<32x32xf32>
    %76 = arith.addf %72, %75 : vector<32x32xf32>
    %cst_54 = arith.constant dense<0.000000e+00> : vector<32xf32>
    %77 = vector.multi_reduction <add>, %76, %cst_54 [1] : vector<32x32xf32> to vector<32xf32>
    %78 = vector.shape_cast %77 : vector<32xf32> to vector<32x1xf32>
    %cst_55 = arith.constant 3.200000e+01 : f32
    %79 = vector.broadcast %cst_55 : f32 to vector<32x1xf32>
    %80 = arith.divf %78, %79 : vector<32x1xf32>
    %81 = vector.broadcast %80 : vector<32x1xf32> to vector<32x32xf32>
    %82 = arith.subf %76, %81 : vector<32x32xf32>
    %83 = arith.mulf %82, %82 : vector<32x32xf32>
    %cst_56 = arith.constant dense<0.000000e+00> : vector<32xf32>
    %84 = vector.multi_reduction <add>, %83, %cst_56 [1] : vector<32x32xf32> to vector<32xf32>
    %85 = vector.shape_cast %84 : vector<32xf32> to vector<32x1xf32>
    %cst_57 = arith.constant 3.200000e+01 : f32
    %86 = vector.broadcast %cst_57 : f32 to vector<32x1xf32>
    %87 = arith.divf %85, %86 : vector<32x1xf32>
    %cst_58 = arith.constant 9.99999974E-6 : f32
    %88 = vector.broadcast %cst_58 : f32 to vector<32x1xf32>
    %89 = arith.addf %87, %88 : vector<32x1xf32>
    %90 = math.rsqrt %89 : vector<32x1xf32>
    %91 = vector.broadcast %90 : vector<32x1xf32> to vector<32x32xf32>
    %92 = arith.mulf %82, %91 : vector<32x32xf32>
    %93 = vector.extract_strided_slice %73 {offsets = [1, 0], sizes = [1, 32], strides = [1, 1]} : vector<3x32xf32> to vector<1x32xf32>
    %94 = vector.broadcast %93 : vector<1x32xf32> to vector<32x32xf32>
    %95 = arith.mulf %92, %94 : vector<32x32xf32>
    %96 = vector.extract_strided_slice %73 {offsets = [2, 0], sizes = [1, 32], strides = [1, 1]} : vector<3x32xf32> to vector<1x32xf32>
    %97 = vector.broadcast %96 : vector<1x32xf32> to vector<32x32xf32>
    %98 = arith.addf %95, %97 : vector<32x32xf32>
    %cst_59 = arith.constant 0.000000e+00 : f32
    %99 = vector.broadcast %cst_59 : f32 to vector<32x32xf32>
    %100 = arith.maximumf %98, %99 : vector<32x32xf32>
    %c0_60 = arith.constant 0 : index
    %c0_61 = arith.constant 0 : index
    %101 = vector.load %arg6[%c0_60, %c0_61] : memref<16x32xf32, #tpu.memory_space<vmem>>, vector<16x32xf32>
    %cst_62 = arith.constant dense<0.000000e+00> : vector<16x32xf32>
    %102 = tpu.matmul %101, %100, %cst_62 {dimension_numbers = #tpu.dot_dimension_numbers<[1], [0], [0], [1], [0, 0, 1, 1], [], []>} : vector<16x32xf32>, vector<32x32xf32>, vector<16x32xf32> -> vector<16x32xf32>
    %c0_63 = arith.constant 0 : index
    %c0_64 = arith.constant 0 : index
    %103 = vector.load %arg7[%c0_63, %c0_64] : memref<16x32xf32, #tpu.memory_space<vmem>>, vector<16x32xf32>
    tpu.vector_store %arg7[%c0_63, %c0_64], %102 {strides = array<i32>} : memref<16x32xf32, #tpu.memory_space<vmem>>, vector<16x32xf32>,
    return
  }
  func.func @transform_0(%arg0: i32) -> (i32, i32) {
    %c0_i32 = arith.constant 0 : i32
    %c0_i32_0 = arith.constant 0 : i32
    return %arg0, %c0_i32 : i32, i32
  }
  func.func @transform_1(%arg0: i32) -> (i32, i32) {
    %c0_i32 = arith.constant 0 : i32
    %c0_i32_0 = arith.constant 0 : i32
    %c0_i32_1 = arith.constant 0 : i32
    return %c0_i32, %c0_i32_0 : i32, i32
  }
  func.func @transform_2(%arg0: i32) -> (i32, i32) {
    %c0_i32 = arith.constant 0 : i32
    %c0_i32_0 = arith.constant 0 : i32
    %c0_i32_1 = arith.constant 0 : i32
    return %c0_i32, %c0_i32_0 : i32, i32
  }
  func.func @transform_3(%arg0: i32) -> (i32, i32) {
    %c0_i32 = arith.constant 0 : i32
    %c0_i32_0 = arith.constant 0 : i32
    %c0_i32_1 = arith.constant 0 : i32
    return %c0_i32, %c0_i32_0 : i32, i32
  }
  func.func @transform_4(%arg0: i32) -> (i32, i32) {
    %c0_i32 = arith.constant 0 : i32
    %c0_i32_0 = arith.constant 0 : i32
    %c0_i32_1 = arith.constant 0 : i32
    return %c0_i32, %c0_i32_0 : i32, i32
  }
  func.func @transform_5(%arg0: i32) -> (i32, i32) {
    %c0_i32 = arith.constant 0 : i32
    %c0_i32_0 = arith.constant 0 : i32
    %c0_i32_1 = arith.constant 0 : i32
    return %c0_i32, %c0_i32_0 : i32, i32
  }
  func.func @transform_6(%arg0: i32) -> (i32, i32) {
    %c0_i32 = arith.constant 0 : i32
    %c0_i32_0 = arith.constant 0 : i32
    return %arg0, %c0_i32 : i32, i32
  }
}

</mosaic_0001>

<bundles_post_ra>
// kernel: tpu_custom_call.1
= control target key start
LH: loop header
LB: loop body
LE: loop exit
PB: predicated region body
PF: predicated region fallthrough
CT: control target
= control target key end

     0   :  { %11 = vsyncpa [#allocation5], 0  ;;  %s1672_s0 = inlined_call_operand.vmem [shape: bf16[128,21], index: 0, kind: input, shape index: {}]   ;;  %s1673_s1 = inlined_call_operand.vmem [shape: bf16[21,16], index: 1, kind: input, shape index: {}]   ;;  %s1674_s2 = inlined_call_operand.vmem [shape: f32[3,16], index: 2, kind: input, shape index: {}]   ;;  %s1675_s3 = inlined_call_operand.vmem [shape: bf16[112,32], index: 3, kind: input, shape index: {}]   ;;  %s1676_s4 = inlined_call_operand.vmem [shape: f32[3,32], index: 4, kind: input, shape index: {}]   ;;  %s1677_s5 = inlined_call_operand.vmem [shape: f32[16,32], index: 5, kind: input, shape index: {}]   ;;  %s1678_s6 = inlined_call_operand.hbm [shape: f32[32,32], index: 6, kind: output, shape index: {}]  }
   0x1   :  { %13 = vsyncpa [#allocation5 + $0x1], 0  ;;  %s1401_s21 = smov 0   ;;  %s1403_s22 = smov 0  }
   0x2   :  { %s1405_s23 = smov 0   ;;  %s1407_s24 = smov 0  }
   0x3 LB: > { %s1422_s25 = sadd.s32 4294967295, %s1353_s24   ;;  %s1041_s26 = sadd.s32 4294967294, %s1353_s24   ;;  %s1353_s24 = sphi %s1407_s24, %s1684_s24   ;;  %s1349_s23 = sphi %s1405_s23, %s1683_s23   ;;  %s1345_s22 = sphi %s1403_s22, %s1682_s22   ;;  %s1341_s21 = sphi %s1401_s21, %s1681_s21  }
   0x4   : > { %s1426_s27 = sadd.s32 1, %s1353_s24   ;;  %s157_s28 = sadd.s32 1, %s1349_s23 }
   0x5   : > { %s154_s29 = ssub.s32 %s1353_s24, %s1426_s27  ;;  %p167_p0 = scmp.ne.s32.totalorder %s1349_s23, %s1345_s22 }
   0x6   : > { %p155_p1 = scmp.eq.s32.totalorder %s154_s29, 0  ;;  %p168_p2 = scmp.eq.s32.totalorder %s1422_s25, 1 }
   0x7   : > { %p173_p3 = scmp.ne.s32.totalorder %s1345_s22, %s1341_s21  ;;  %p174_p4 = scmp.eq.s32.totalorder %s1041_s26, 1 }
   0x8   : > { %s1437_s30 = scalar_select %p155_p1, %s1349_s23, %s157_s28  }
   0x9   : > { %p1439_p5 = por %p168_p2, %p167_p0  ;;  %p1443_p6 = por %p174_p4, %p173_p3 }
   0xa   : > { %p1044_p7 = scmp.ge.s32.totalorder %s1353_s24, 1  ;;  %p216_p8 = scmp.lt.s32.totalorder %s1353_s24, 3 }
   0xc   : > { %p217_p9 = pnand %p1044_p7, %p216_p8 }
   0xd   : > { %v1254_v0 = vld [vmem:[%s1673_s1] sm:$0xff] (!%p217_p9)   ;;  %vm312_vm0 = vcmask (!%p217_p9), 1041408   ;;  %v1255_v1 = vld [vmem:[%s1673_s1 + $0x8] ss:$0 sps:$4 sm:$0x77] (!%p217_p9)   ;;  %vm313_vm1 = vcmask (!%p217_p9), 1042432   ;;  %v266_v10 = vlaneseq (!%p217_p9) }
   0xe   : > { %220 = sbr.rel (%p217_p9) target bundleno = 1485 (0x5cd), region = 44  ;;  %1096 = vmatprep.subr.bf16.mxu0 (!%p217_p9), %v1254_v0  ;;  %s1046_s13 = sshll.u32 (!%p217_p9), %s1422_s25, 3  ;;  %v1355_v2 = vmov (!%p217_p9), 65535   ;;  %vm299_vm2 = vcmask (!%p217_p9), 171008   ;;  %v1465_v13 = vld [vmem:[%s1674_s2] sm:$0x7] (!%p217_p9) }
   0xf   : > { %1097 = vmatpush3.bf16.msra.mxu0 (!%p217_p9), %v1254_v0  ;;  %v314_v3 = vsel (!%p217_p9), %vm312_vm0, 4294967295, %v1355_v2  ;;  %p247_p10 = scmp.lt.s32.totalorder (!%p217_p9), %s1046_s13, 15  ;;  %v1459_v11 = vshrl.u32 (!%p217_p9), %v266_v10, 7  ;;  %vm384_vm3 = vcmask (!%p217_p9), 130048   ;;  %vm523_vm4 = vcmask (!%p217_p9), 122880   ;;  %s1359_s15 = smov (!%p217_p9), 16  }
  0x10   : > { %v315_v4 = vsel (!%p217_p9), %vm313_vm1, %v314_v3, 0  ;;  %s1360_s20 = smov (!%p217_p9), 64   ;;  %s1361_s29 = smov (!%p217_p9), 32   ;;  %vm663_vm5 = vcmask (!%p217_p9), 261120   ;;  %vm668_vm6 = vcmask (!%p217_p9), 392192   ;;  %vm673_vm7 = vcmask (!%p217_p9), 523264  }
  0x11   : > { %v317_v5 = vand.u32 (!%p217_p9), %v1255_v1, %v315_v4  ;;  %v268_v12 = vsub.s32 (!%p217_p9), 0, %v1459_v11  ;;  %s1362_s9 = smov (!%p217_p9), 96   ;;  %vm678_vm8 = vcmask (!%p217_p9), 654336   ;;  %vm683_vm9 = vcmask (!%p217_p9), 785408   ;;  %s243_s16 = sand.u32 (!%p217_p9), 1, %s1345_s22  }
  0x12   : > { %vm751_vm10 = vcmask (!%p217_p9), 916480  }
  0x13   : > { %1098 = vmatprep.subr.bf16.mxu0 (!%p217_p9), %v317_v5  ;;  %v269_v14 = vrot.slane (!%p217_p9), %v1465_v13, %v268_v12 }
  0x14   : > { %1099 = vmatpush3.bf16.msra.mxu0 (!%p217_p9), %v317_v5 }
  0x15   : > { %s1686_s13 = smov (!%p247_p10, %s1046_s13), 15 }
  0x16   : > { %s1047_s14 = sshll.u32 %s1686_s13, 2  ;;  %s1357_s13 = smov 48  }
  0x17   : > { %s250_s17 = scalar_lea.vmem %s1672_s0, %s1047_s14  ;;  %s1358_s14 = smov 80  }
  0x18   : > { %v1256_v6 = vld [vmem:[%s250_s17] sm:$0xff]   ;;  %v1257_v7 = vld [vmem:[%s250_s17 + $0x8] sm:$0xff]   ;;  %v1258_v8 = vld [vmem:[%s250_s17 + $0x10] sm:$0xff]  }
  0x19   : > { %1100 = vmatprep.mubr.msk.bf16.mxu0 %vm299_vm2, %v1256_v6  ;;  %v1259_v9 = vld [vmem:[%s250_s17 + $0x18] sm:$0xff]   ;;  %s1045_s17 = sshll.u32 %s243_s16, 4 }
  0x1a   : > { %1101 = vmatmul.mubr.msk.bf16.vlgmr.msra.gmra.mrb[0].mxu0 %vm299_vm2, %v1257_v7  ;;  %s245_s18 = scalar_lea.vmem [#allocation4], %s1045_s17 }
  0x1b   : > { %1104 = vmatprep.mubr.msk.bf16.mxu0 %vm299_vm2, %v1258_v8  ;;  %s979_s19 = sshll.u32 %s245_s18, 4  ;;  %s1622_s19 = int_to_ptr.vmem [resolvable:$true] %s979_s19 }
  0x1c   : > { %s1291_s10 = scalar_lea.vmem %s1622_s19, 256 }
  0x1d   : > { %p1292_p11 = scmp.ne.s32.totalorder %s1622_s19, %s1291_s10 }
  0x1f   : > { %p1293_p12 = pnand %p1292_p11, %p1439_p5 }
  0x21   : > { %p1294_p13 = pneg %p1293_p12 }
  0x22   : > { %1105 = vmatmul.mubr.msk.bf16.gmra.mrb[4].mxu0 %vm299_vm2, %v1259_v9 }
  0xed   : > { %v1102_v15 = vpop.f32.mrb[0].mxu0 }
  0xee   : > { %v362_v16 = vadd.f32 %v1102_v15, %v269_v14  ;;  %v353_v17 = vpop.f32.mrb[1].mxu0 }
  0xef   : > { %v354_v18 = vadd.f32 %v353_v17, %v269_v14  ;;  %v1103_v19 = vpop.f32.mrb[2].mxu0 }
  0xf0   : > { %v365_v20 = vadd.f32 %v1103_v19, %v269_v14  ;;  %v356_v21 = vpop.f32.mrb[3].mxu0  ;;  %v391_v22 = vsel %vm384_vm3, %v362_v16, 0.0 }
  0xf1   : > { %v357_v23 = vadd.f32 %v356_v21, %v269_v14  ;;  %392 = vadd.xlane.f32.xlu1 %v391_v22  ;;  %v385_v24 = vsel %vm384_vm3, %v354_v18, 0.0 }
  0xf2   : > { %386 = vadd.xlane.f32.xlu0 %v385_v24  ;;  %v394_v25 = vsel %vm384_vm3, %v365_v20, 0.0 }
  0xf3   : > { %v388_v27 = vsel %vm384_vm3, %v357_v23, 0.0 }
  0xf5   : > { %395 = vadd.xlane.f32.xlu1 %v394_v25  ;;  %v1106_v26 = vpop.f32.mrb[4].mxu0 }
  0xf6   : > { %v369_v28 = vpop.f32.mrb[5].mxu0  ;;  %389 = vadd.xlane.f32.xlu0 %v388_v27  ;;  %v378_v32 = vadd.f32 %v1106_v26, %v269_v14 }
  0xf7   : > { %v370_v29 = vadd.f32 %v369_v28, %v269_v14  ;;  %v1107_v30 = vpop.f32.mrb[6].mxu0 }
  0xf8   : > { %v372_v31 = vpop.f32.mrb[7].mxu0  ;;  %v381_v35 = vadd.f32 %v1107_v30, %v269_v14  ;;  %v403_v37 = vsel %vm384_vm3, %v378_v32, 0.0 }
  0xf9   : > { %v373_v33 = vadd.f32 %v372_v31, %v269_v14  ;;  %v397_v34 = vsel %vm384_vm3, %v370_v29, 0.0  ;;  %v492_v31 = vsub.s32 1, %v1459_v11 }
  0xfa   : > { %398 = vadd.xlane.f32.xlu0 %v397_v34  ;;  %v406_v38 = vsel %vm384_vm3, %v381_v35, 0.0  ;;  %v504_v34 = vsub.s32 2, %v1459_v11 }
  0xfb   : > { %v400_v36 = vsel %vm384_vm3, %v373_v33, 0.0 }
  0xfc   : > { %401 = vadd.xlane.f32.xlu1 %v400_v36 }
  0xfe   : > { %404 = vadd.xlane.f32.xlu0 %v403_v37 }
 0x100   : > { %407 = vadd.xlane.f32.xlu1 %v406_v38 }
 0x17e   : > { %v393_v39 = vpop.xlane.xlu1 %392 }
 0x17f   : > { %v412_v40 = vmul.f32 0.0625, %v393_v39  ;;  %v387_v41 = vpop.xlane.xlu0 %386  ;;  %v493_v39 = vrot.slane %v1465_v13, %v492_v31 }
 0x180   : > { %v410_v42 = vmul.f32 0.0625, %v387_v41 }
 0x181   : > { %v1478_v43 = vsub.f32 %v362_v16, %v412_v40 }
 0x182   : > { %v1480_v44 = vsub.f32 %v354_v18, %v410_v42  ;;  %v396_v45 = vpop.xlane.xlu1 %395  ;;  %v1356_v18 = vmov 0.0  }
 0x183   : > { %v413_v46 = vmul.f32 0.0625, %v396_v45  ;;  %v390_v47 = vpop.xlane.xlu0 %389  ;;  %v428_v48 = vmul.f32 %v1478_v43, %v1478_v43  ;;  %530 = vst.msk [vmem:[#allocation3 + $0x28] sm:$0x1] %vm523_vm4, %v1356_v18  ;;  %524 = vst.msk [vmem:[#allocation2 + $0x28] sm:$0x1] %vm523_vm4, %v1356_v18  ;;  %v505_v45 = vrot.slane %v1465_v13, %v504_v34 }
 0x184   : > { %v411_v49 = vmul.f32 0.0625, %v390_v47  ;;  %v426_v52 = vmul.f32 %v1480_v44, %v1480_v44  ;;  %522 = vst.msk [vmem:[#allocation2] sm:$0xff] %vm384_vm3, %v1356_v18  ;;  %529 = vst.msk [vmem:[#allocation3] sm:$0xff] %vm384_vm3, %v1356_v18  ;;  %v1261_v18 = vld [vmem:[%s1675_s3 + $0x8] sm:$0xff]  }
 0x185   : > { %v1484_v50 = vsub.f32 %v365_v20, %v413_v46  ;;  %v440_v51 = vsel %vm384_vm3, %v428_v48, 0.0 }
 0x186   : > { %v1489_v53 = vsub.f32 %v357_v23, %v411_v49  ;;  %441 = vadd.xlane.f32.xlu0 %v440_v51  ;;  %v434_v59 = vsel %vm384_vm3, %v426_v52, 0.0 }
 0x187   : > { %v399_v54 = vpop.xlane.xlu0 %398  ;;  %v429_v55 = vmul.f32 %v1484_v50, %v1484_v50 }
 0x188   : > { %v414_v56 = vmul.f32 0.0625, %v399_v54  ;;  %v427_v60 = vmul.f32 %v1489_v53, %v1489_v53 }
 0x189   : > { %v402_v57 = vpop.xlane.xlu1 %401  ;;  %v443_v58 = vsel %vm384_vm3, %v429_v55, 0.0 }
 0x18a   : > { %v1497_v61 = vsub.f32 %v370_v29, %v414_v56  ;;  %v415_v62 = vmul.f32 0.0625, %v402_v57  ;;  %444 = vadd.xlane.f32.xlu1 %v443_v58  ;;  %435 = vadd.xlane.f32.xlu0 %v434_v59  ;;  %v437_v4 = vsel %vm384_vm3, %v427_v60, 0.0 }
 0x18b   : > { %v405_v63 = vpop.xlane.xlu0 %404 }
 0x18c   : > { %v1499_v0 = vsub.f32 %v373_v33, %v415_v62  ;;  %v416_v1 = vmul.f32 0.0625, %v405_v63  ;;  %v430_v2 = vmul.f32 %v1497_v61, %v1497_v61 }
 0x18d   : > { %v408_v3 = vpop.xlane.xlu1 %407 }
 0x18e   : > { %v1504_v5 = vsub.f32 %v378_v32, %v416_v1  ;;  %v417_v6 = vmul.f32 0.0625, %v408_v3  ;;  %438 = vadd.xlane.f32.xlu1 %v437_v4  ;;  %v446_v7 = vsel %vm384_vm3, %v430_v2, 0.0  ;;  %v431_v8 = vmul.f32 %v1499_v0, %v1499_v0 }
 0x18f   : > { %447 = vadd.xlane.f32.xlu0 %v446_v7 }
 0x190   : > { %v1509_v9 = vsub.f32 %v381_v35, %v417_v6  ;;  %v449_v10 = vsel %vm384_vm3, %v431_v8, 0.0  ;;  %v432_v14 = vmul.f32 %v1504_v5, %v1504_v5 }
 0x192   : > { %450 = vadd.xlane.f32.xlu1 %v449_v10  ;;  %v452_v15 = vsel %vm384_vm3, %v432_v14, 0.0  ;;  %v433_v16 = vmul.f32 %v1509_v9, %v1509_v9 }
 0x193   : > { %453 = vadd.xlane.f32.xlu0 %v452_v15 }
 0x194   : > { %v455_v17 = vsel %vm384_vm3, %v433_v16, 0.0 }
 0x196   : > { %456 = vadd.xlane.f32.xlu1 %v455_v17 }
 0x213   : > { %v442_v19 = vpop.xlane.xlu0 %441 }
 0x214   : > { %v460_v20 = vmul.f32 0.0625, %v442_v19 }
 0x216   : > { %v468_v21 = vadd.f32 1e-05, %v460_v20 }
 0x217   : > { %v445_v22 = vpop.xlane.xlu1 %444  ;;  %v436_v23 = vpop.xlane.xlu0 %435 }
 0x218   : > { %1267 = vrsqrt.f32 %v468_v21  ;;  %v461_v24 = vmul.f32 0.0625, %v445_v22  ;;  %v458_v25 = vmul.f32 0.0625, %v436_v23 }
 0x21a   : > { %v469_v26 = vadd.f32 1e-05, %v461_v24  ;;  %v466_v27 = vadd.f32 1e-05, %v458_v25  ;;  %v1262_v25 = vld [vmem:[%s1675_s3 + $0x10] sm:$0xff]  }
 0x21b   : > { %v439_v28 = vpop.xlane.xlu1 %438 }
 0x21c   : > { %1269 = vrsqrt.f32 %v469_v26  ;;  %v459_v29 = vmul.f32 0.0625, %v439_v28  ;;  %v448_v30 = vpop.xlane.xlu0 %447 }
 0x21d   : > { %1271 = vrsqrt.f32 %v466_v27  ;;  %v462_v32 = vmul.f32 0.0625, %v448_v30 }
 0x21e   : > { %v467_v33 = vadd.f32 1e-05, %v459_v29 }
 0x21f   : > { %v470_v35 = vadd.f32 1e-05, %v462_v32  ;;  %v451_v36 = vpop.xlane.xlu1 %450 }
 0x220   : > { %1273 = vrsqrt.f32 %v467_v33  ;;  %v463_v37 = vmul.f32 0.0625, %v451_v36  ;;  %v454_v38 = vpop.xlane.xlu0 %453  ;;  %v1263_v33 = vld [vmem:[%s1675_s3 + $0x18] sm:$0xff]  }
 0x221   : > { %1275 = vrsqrt.f32 %v470_v35  ;;  %v464_v40 = vmul.f32 0.0625, %v454_v38 }
 0x222   : > { %v1268_v41 = vpop.eup %1267  ;;  %v471_v42 = vadd.f32 1e-05, %v463_v37 }
 0x223   : > { %v484_v46 = vmul.f32 %v1268_v41, %v1478_v43  ;;  %v472_v47 = vadd.f32 1e-05, %v464_v40  ;;  %v457_v48 = vpop.xlane.xlu1 %456 }
 0x224   : > { %1277 = vrsqrt.f32 %v471_v42  ;;  %v465_v49 = vmul.f32 0.0625, %v457_v48  ;;  %v1264_v42 = vld [vmem:[%s1675_s3 + $0x20] sm:$0xff]  }
 0x225   : > { %v496_v51 = vmul.f32 %v493_v39, %v484_v46  ;;  %1279 = vrsqrt.f32 %v472_v47 }
 0x226   : > { %v1270_v52 = vpop.eup %1269  ;;  %v473_v54 = vadd.f32 1e-05, %v465_v49 }
 0x227   : > { %v1272_v55 = vpop.eup %1271  ;;  %v508_v56 = vadd.f32 %v505_v45, %v496_v51  ;;  %v485_v57 = vmul.f32 %v1270_v52, %v1484_v50  ;;  %v1260_v50 = vld [vmem:[%s1675_s3] sm:$0xff]   ;;  %v1265_v52 = vld [vmem:[%s1675_s3 + $0x28] sm:$0xff]  }
 0x228   : > { %v482_v58 = vmul.f32 %v1272_v55, %v1480_v44  ;;  %1281 = vrsqrt.f32 %v473_v54  ;;  %1108 = vmatprep.subr.bf16.mxu1 %v1260_v50 }
 0x229   : > { %v516_v59 = vmax.f32 %v508_v56, 0.0  ;;  %v497_v60 = vmul.f32 %v493_v39, %v485_v57  ;;  %1109 = vmatpush3.bf16.msra.mxu1 %v1260_v50 }
 0x22a   : > { %v1274_v13 = vpop.eup %1273  ;;  %v494_v62 = vmul.f32 %v493_v39, %v482_v58  ;;  %1110 = vmatprep.subr.bf16.mxu1 %v1261_v18 }
 0x22b   : > { %v1276_v43 = vpop.eup %1275  ;;  %533 = vst.msk [vmem:[#allocation3 + $0x18] sm:$0xff] %vm384_vm3, %v516_v59  ;;  %v509_v63 = vadd.f32 %v505_v45, %v497_v60  ;;  %v483_v1 = vmul.f32 %v1274_v13, %v1489_v53  ;;  %v1266_v60 = vld [vmem:[%s1675_s3 + $0x30] sm:$0xff]  }
 0x22c   : > { %v506_v2 = vadd.f32 %v505_v45, %v494_v62  ;;  %v486_v3 = vmul.f32 %v1276_v43, %v1497_v61 }
 0x22d   : > { %v517_v4 = vmax.f32 %v509_v63, 0.0  ;;  %v495_v44 = vmul.f32 %v493_v39, %v483_v1  ;;  %1111 = vmatpush3.bf16.msra.mxu1 %v1261_v18 }
 0x22e   : > { %v1278_v6 = vpop.eup %1277  ;;  %v514_v7 = vmax.f32 %v506_v2, 0.0  ;;  %v498_v8 = vmul.f32 %v493_v39, %v486_v3  ;;  %1112 = vmatprep.subr.bf16.mxu1 %v1262_v25 }
 0x22f   : > { %v1280_v10 = vpop.eup %1279  ;;  %534 = vst.msk [vmem:[#allocation3 + $0x20] sm:$0xff] %vm384_vm3, %v517_v4  ;;  %v507_v14 = vadd.f32 %v505_v45, %v495_v44  ;;  %v487_v15 = vmul.f32 %v1278_v6, %v1499_v0 }
 0x230   : > { %531 = vst.msk [vmem:[#allocation3 + $0x8] sm:$0xff] %vm384_vm3, %v514_v7  ;;  %v510_v53 = vadd.f32 %v505_v45, %v498_v8  ;;  %v488_v61 = vmul.f32 %v1280_v10, %v1504_v5 }
 0x231   : > { %v515_v16 = vmax.f32 %v507_v14, 0.0  ;;  %v499_v17 = vmul.f32 %v493_v39, %v487_v15  ;;  %1113 = vmatpush3.bf16.msra.mxu1 %v1262_v25 }
 0x232   : > { %v1282_v19 = vpop.eup %1281  ;;  %v518_v20 = vmax.f32 %v510_v53, 0.0  ;;  %v500_v21 = vmul.f32 %v493_v39, %v488_v61  ;;  %v549_v27 = vld [vmem:[#allocation3 + $0x18] sm:$0xff]  ;;  %1114 = vmatprep.subr.bf16.mxu1 %v1263_v33 }
 0x233   : > { %532 = vst.msk [vmem:[#allocation3 + $0x10] sm:$0xff] %vm384_vm3, %v515_v16  ;;  %v511_v22 = vadd.f32 %v505_v45, %v499_v17  ;;  %v489_v0 = vmul.f32 %v1282_v19, %v1509_v9 }
 0x234   : > { %525 = vst.msk [vmem:[#allocation2 + $0x8] sm:$0xff] %vm384_vm3, %v518_v20  ;;  %v512_v23 = vadd.f32 %v505_v45, %v500_v21 }
 0x235   : > { %v519_v5 = vmax.f32 %v511_v22, 0.0  ;;  %v501_v24 = vmul.f32 %v493_v39, %v489_v0  ;;  %1115 = vmatpush3.bf16.msra.mxu1 %v1263_v33 }
 0x236   : > { %v520_v26 = vmax.f32 %v512_v23, 0.0  ;;  %v550_v28 = vld [vmem:[#allocation3 + $0x20] sm:$0xff]  ;;  %1116 = vmatprep.subr.bf16.mxu1 %v1264_v42 }
 0x237   : > { %526 = vst.msk [vmem:[#allocation2 + $0x10] sm:$0xff] %vm384_vm3, %v519_v5  ;;  %v513_v29 = vadd.f32 %v505_v45, %v501_v24  ;;  %v1194_v30 = vpack.i.bf16 %v550_v28, %v549_v27  ;;  %v557_v9 = vld [vmem:[#allocation3 + $0x19] sm:$0xff]  ;;  %v558_v32 = vld [vmem:[#allocation3 + $0x21] sm:$0xff] }
 0x238   : > { %527 = vst.msk [vmem:[#allocation2 + $0x18] sm:$0xff] %vm384_vm3, %v520_v26  ;;  %v539_v36 = vld [vmem:[#allocation3 + $0x7] sm:$0xff]  ;;  %v1199_v38 = vpack.i.bf16 %v558_v32, %v557_v9  ;;  %v542_v45 = vld [vmem:[#allocation3 + $0x1f] sm:$0xff] }
 0x239   : > { %v521_v35 = vmax.f32 %v513_v29, 0.0  ;;  %1195 = vrot.lane.b32.xlu1 %v1194_v30, %s1357_s13  ;;  %v547_v46 = vld [vmem:[#allocation3 + $0x8] sm:$0xff]  ;;  %1117 = vmatpush3.bf16.msra.mxu1 %v1264_v42 }
 0x23a   : > { %v540_v37 = vld [vmem:[#allocation3 + $0xf] sm:$0xff]  ;;  %v541_v40 = vld [vmem:[#allocation3 + $0x17] sm:$0xff]  ;;  %1118 = vmatprep.subr.bf16.mxu1 %v1265_v52 }
 0x23b   : > { %528 = vst.msk [vmem:[#allocation2 + $0x20] sm:$0xff] %vm384_vm3, %v521_v35  ;;  %v1204_v39 = vpack.i.bf16 %v540_v37, %v539_v36  ;;  %v548_v41 = vld [vmem:[#allocation3 + $0x10] sm:$0xff]  ;;  %v1209_v47 = vpack.i.bf16 %v542_v45, %v541_v40  ;;  %v551_v13 = vld [vmem:[#allocation2 + $0x8] sm:$0xff] }
 0x23c   : > { %v1214_v48 = vpack.i.bf16 %v548_v41, %v547_v46  ;;  %v555_v49 = vld [vmem:[#allocation3 + $0x9] sm:$0xff]  ;;  %v556_v51 = vld [vmem:[#allocation3 + $0x11] sm:$0xff] }
 0x23d   : > { %1200 = vrot.lane.b32.xlu1 %v1199_v38, %s1358_s14  ;;  %1205 = vrot.lane.b32.xlu0 %v1204_v39, %s1359_s15  ;;  %v1219_v56 = vpack.i.bf16 %v556_v51, %v555_v49  ;;  %v543_v62 = vld [vmem:[#allocation2 + $0x7] sm:$0xff] }
 0x23e   : > { %v552_v58 = vld [vmem:[#allocation2 + $0x10] sm:$0xff]  ;;  %1119 = vmatpush3.bf16.msra.mxu1 %v1265_v52  ;;  %v535_v24 = vld [vmem:[#allocation2 + $0x6] sm:$0xff] }
 0x23f   : > { %v553_v54 = vld [vmem:[#allocation2 + $0x18] sm:$0xff]  ;;  %v544_v59 = vld [vmem:[#allocation2 + $0xf] sm:$0xff]  ;;  %v1239_v43 = vpack.i.bf16 %v552_v58, %v551_v13  ;;  %1120 = vmatprep.subr.bf16.mxu1 %v1266_v60 }
 0x240   : > { %v1229_v63 = vpack.i.bf16 %v544_v59, %v543_v62  ;;  %v559_v1 = vld [vmem:[#allocation2 + $0x9] sm:$0xff]  ;;  %v560_v2 = vld [vmem:[#allocation2 + $0x11] sm:$0xff] }
 0x241   : > { %1210 = vrot.lane.b32.xlu1 %v1209_v47, %s1359_s15  ;;  %1215 = vrot.lane.b32.xlu0 %v1214_v48, %s1357_s13  ;;  %v545_v50 = vld [vmem:[#allocation2 + $0x17] sm:$0xff]  ;;  %v1244_v4 = vpack.i.bf16 %v560_v2, %v559_v1  ;;  %v536_v25 = vld [vmem:[#allocation2 + $0xe] sm:$0xff] }
 0x242   : > { %v554_v55 = vld [vmem:[#allocation2 + $0x20] sm:$0xff]  ;;  %1121 = vmatpush3.bf16.msra.mxu1 %v1266_v60  ;;  %v537_v30 = vld [vmem:[#allocation2 + $0x16] sm:$0xff] }
 0x243   : > { %v1224_v57 = vpack.i.bf16 %v554_v55, %v553_v54  ;;  %v546_v3 = vld [vmem:[#allocation2 + $0x1f] sm:$0xff] }
 0x244   : > { %v1234_v44 = vpack.i.bf16 %v546_v3, %v545_v50  ;;  %v561_v6 = vld [vmem:[#allocation2 + $0x19] sm:$0xff]  ;;  %v562_v7 = vld [vmem:[#allocation2 + $0x21] sm:$0xff] }
 0x245   : > { %1220 = vrot.lane.b32.xlu0 %v1219_v56, %s1358_s14  ;;  %1225 = vrot.lane.b32.xlu1 %v1224_v57, %s1360_s20  ;;  %v1249_v8 = vpack.i.bf16 %v562_v7, %v561_v6  ;;  %v538_v9 = vld [vmem:[#allocation2 + $0x1e] sm:$0xff] }
 0x249   : > { %1240 = vrot.lane.b32.xlu0 %v1239_v43, %s1360_s20  ;;  %1230 = vrot.lane.b32.xlu1 %v1229_v63, %s1361_s29  ;;  %s1074_s20 = sshll.u32 %s1422_s25, 8  ;;  %s1363_s25 = smov [#allocation4]  }
 0x24a   : > { %s1295_s11 = sshll.u32 %s1363_s25, 4  ;;  %s1296_s11 = int_to_ptr.vmem [resolvable:$false] %s1295_s11 }
 0x24b   : > { %s1297_s12 = scalar_lea.vmem %s1296_s11, 512  ;;  %p1298_p0 = scmp.lt.s32.totalorder %s1622_s19, %s1296_s11 }
 0x24c   : > { %p1299_p1 = scmp.lt.s32.totalorder %s1297_s12, %s1291_s10 }
 0x24d   : > { %1245 = vrot.lane.b32.xlu0 %v1244_v4, %s1362_s9  ;;  %1235 = vrot.lane.b32.xlu1 %v1234_v44, %s1361_s29  ;;  %s1627_s29 = scalar_lea.hbm %s1678_s6, %s1074_s20 }
 0x24e   : > { %p1300_p2 = por %p1299_p1, %p1298_p0 }
 0x250   : > { %p1301_p3 = pnand %p1300_p2, %p1294_p13 }
 0x251   : > { %1250 = vrot.lane.b32.xlu1 %v1249_v8, %s1362_s9  ;;  %s1631_s9 = scalar_lea.sflag [#allocation5], %s243_s16 }
 0x2ab   : > { %v1196_v10 = vpop.permute.xlu1 %1195 }
 0x2ac   : > { %v1198_v22 = vunpack.i.h.bf16 %v1196_v10  ;;  %v1197_v0 = vunpack.i.l.bf16 %v1196_v10 }
 0x2af   : > { %v1565_v14 = vpop.permute.xlu1 %1200  ;;  %v1206_v15 = vpop.permute.xlu0 %1205 }
 0x2b0   : > { %v1208_v18 = vunpack.i.h.bf16 %v1206_v15  ;;  %v1207_v19 = vunpack.i.l.bf16 %v1206_v15  ;;  %v1203_v23 = vunpack.i.h.bf16 %v1565_v14  ;;  %v1202_v5 = vunpack.i.l.bf16 %v1565_v14 }
 0x2b2   : > { %v660_v28 = vsel %vm384_vm3, %v536_v25, %v1208_v18  ;;  %v659_v29 = vsel %vm384_vm3, %v535_v24, %v1207_v19 }
 0x2b3   : > { %v1211_v53 = vpop.permute.xlu1 %1210  ;;  %v1216_v61 = vpop.permute.xlu0 %1215 }
 0x2b4   : > { %v1213_v20 = vunpack.i.h.bf16 %v1211_v53  ;;  %v1212_v21 = vunpack.i.l.bf16 %v1211_v53  ;;  %v1218_v37 = vunpack.i.h.bf16 %v1216_v61  ;;  %v1217_v38 = vunpack.i.l.bf16 %v1216_v61 }
 0x2b6   : > { %v661_v35 = vsel %vm384_vm3, %v537_v30, %v1212_v21  ;;  %v662_v36 = vsel %vm384_vm3, %v538_v9, %v1213_v20 }
 0x2b7   : > { %v1226_v16 = vpop.permute.xlu1 %1225  ;;  %v1221_v17 = vpop.permute.xlu0 %1220 }
 0x2b8   : > { %v1223_v45 = vunpack.i.h.bf16 %v1221_v17  ;;  %v1222_v46 = vunpack.i.l.bf16 %v1221_v17  ;;  %v1228_v13 = vunpack.i.h.bf16 %v1226_v16  ;;  %v1227_v62 = vunpack.i.l.bf16 %v1226_v16  ;;  %v704_v17 = vld [vmem:[%s1676_s4] sm:$0x7] }
 0x2b9   : > { %v708_v18 = vrot.slane %v704_v17, %v268_v12 }
 0x2bb   : > { %v1231_v26 = vpop.permute.xlu1 %1230  ;;  %v1241_v27 = vpop.permute.xlu0 %1240 }
 0x2bc   : > { %v1233_v32 = vunpack.i.h.bf16 %v1231_v26  ;;  %v1232_v33 = vunpack.i.l.bf16 %v1231_v26  ;;  %v1243_v41 = vunpack.i.h.bf16 %v1241_v27  ;;  %v1242_v42 = vunpack.i.l.bf16 %v1241_v27 }
 0x2be   : > { %v664_v39 = vsel %vm663_vm5, %v659_v29, %v1232_v33  ;;  %v665_v40 = vsel %vm663_vm5, %v660_v28, %v1233_v32 }
 0x2bf   : > { %v669_v47 = vsel %vm668_vm6, %v664_v39, %v1217_v38  ;;  %v670_v48 = vsel %vm668_vm6, %v665_v40, %v1218_v37  ;;  %v1236_v49 = vpop.permute.xlu1 %1235  ;;  %v1246_v51 = vpop.permute.xlu0 %1245 }
 0x2c0   : > { %v674_v52 = vsel %vm673_vm7, %v669_v47, %v1242_v42  ;;  %v675_v54 = vsel %vm673_vm7, %v670_v48, %v1243_v41  ;;  %v1238_v55 = vunpack.i.h.bf16 %v1236_v49  ;;  %v1237_v56 = vunpack.i.l.bf16 %v1236_v49 }
 0x2c1   : > { %v1248_v57 = vunpack.i.h.bf16 %v1246_v51  ;;  %v1247_v58 = vunpack.i.l.bf16 %v1246_v51  ;;  %v679_v59 = vsel %vm678_vm8, %v674_v52, %v1222_v46  ;;  %v680_v60 = vsel %vm678_vm8, %v675_v54, %v1223_v45  ;;  %v880_v52 = vld [vmem:[%s1677_s5] sm:$0xff] }
 0x2c2   : > { %v666_v43 = vsel %vm663_vm5, %v661_v35, %v1237_v56  ;;  %v667_v63 = vsel %vm663_vm5, %v662_v36, %v1238_v55  ;;  %1134 = vmatprep.mubr.msk.f32.mxu0 %vm663_vm5, %v880_v52 }
 0x2c3   : > { %v671_v1 = vsel %vm668_vm6, %v666_v43, %v1197_v0  ;;  %v672_v2 = vsel %vm668_vm6, %v667_v63, %v1198_v22  ;;  %v1251_v3 = vpop.permute.xlu1 %1250  ;;  %v684_v50 = vsel %vm683_vm9, %v679_v59, %v1247_v58  ;;  %v685_v4 = vsel %vm683_vm9, %v680_v60, %v1248_v57 }
 0x2c4   : > { %v1253_v44 = vunpack.i.h.bf16 %v1251_v3  ;;  %v1252_v6 = vunpack.i.l.bf16 %v1251_v3  ;;  %v676_v7 = vsel %vm673_vm7, %v671_v1, %v1227_v62  ;;  %v677_v8 = vsel %vm673_vm7, %v672_v2, %v1228_v13 }
 0x2c5   : > { %v681_v10 = vsel %vm678_vm8, %v676_v7, %v1202_v5  ;;  %v682_v14 = vsel %vm678_vm8, %v677_v8, %v1203_v23  ;;  %v688_v15 = vpack.c.bf16 %v685_v4, %v684_v50  ;;  %v863_v2 = vrot.slane %v704_v17, %v492_v31 }
 0x2c6   : > { %v686_v53 = vsel %vm683_vm9, %v681_v10, %v1252_v6  ;;  %v687_v61 = vsel %vm683_vm9, %v682_v14, %v1253_v44  ;;  %v871_v50 = vrot.slane %v704_v17, %v504_v34 }
 0x2c7   : > { %v689_v16 = vpack.c.bf16 %v687_v61, %v686_v53  ;;  %1122 = vmatprep.mubr.msk.bf16.mxu1 %vm751_vm10, %v688_v15 }
 0x2c9   : > { %1123 = vmatmul.mubr.msk.bf16.vlgmr.msra.gmra.mrb[0].mxu1 %vm751_vm10, %v689_v16 }
 0x39c   : > { %v1124_v19 = vpop.f32.mrb[0].mxu1 }
 0x39d   : > { %v792_v20 = vpop.f32.mrb[1].mxu1  ;;  %v801_v23 = vadd.f32 %v1124_v19, %v708_v18 }
 0x39e   : > { %v793_v21 = vadd.f32 %v792_v20, %v708_v18  ;;  %v1125_v22 = vpop.f32.mrb[2].mxu1 }
 0x39f   : > { %v795_v0 = vpop.f32.mrb[3].mxu1  ;;  %v804_v26 = vadd.f32 %v1125_v22, %v708_v18  ;;  %v813_v27 = vsel %vm663_vm5, %v801_v23, 0.0 }
 0x3a0   : > { %v796_v5 = vadd.f32 %v795_v0, %v708_v18  ;;  %v807_v24 = vsel %vm663_vm5, %v793_v21, 0.0 }
 0x3a1   : > { %808 = vadd.xlane.f32.xlu0 %v807_v24  ;;  %v816_v28 = vsel %vm663_vm5, %v804_v26, 0.0 }
 0x3a2   : > { %v810_v25 = vsel %vm663_vm5, %v796_v5, 0.0 }
 0x3a3   : > { %811 = vadd.xlane.f32.xlu1 %v810_v25 }
 0x3a5   : > { %814 = vadd.xlane.f32.xlu0 %v813_v27 }
 0x3a9   : > { %817 = vadd.xlane.f32.xlu0 %v816_v28 }
 0x42e   : > { %v809_v12 = vpop.xlane.xlu0 %808 }
 0x42f   : > { %v820_v29 = vmul.f32 0.03125, %v809_v12 }
 0x430   : > { %v812_v30 = vpop.xlane.xlu1 %811 }
 0x431   : > { %v824_v9 = vsub.f32 %v793_v21, %v820_v29  ;;  %v821_v32 = vmul.f32 0.03125, %v812_v30 }
 0x432   : > { %v815_v33 = vpop.xlane.xlu0 %814 }
 0x433   : > { %v825_v35 = vsub.f32 %v796_v5, %v821_v32  ;;  %v822_v36 = vmul.f32 0.03125, %v815_v33  ;;  %v828_v37 = vmul.f32 %v824_v9, %v824_v9 }
 0x435   : > { %v826_v38 = vsub.f32 %v801_v23, %v822_v36  ;;  %v832_v39 = vsel %vm663_vm5, %v828_v37, 0.0  ;;  %v829_v40 = vmul.f32 %v825_v35, %v825_v35  ;;  %v881_v23 = vld [vmem:[%s1677_s5 + $0x8] sm:$0xff] }
 0x436   : > { %833 = vadd.xlane.f32.xlu0 %v832_v39  ;;  %v818_v41 = vpop.xlane.xlu0 %817 }
 0x437   : > { %v823_v42 = vmul.f32 0.03125, %v818_v41  ;;  %v835_v45 = vsel %vm663_vm5, %v829_v40, 0.0  ;;  %v830_v46 = vmul.f32 %v826_v38, %v826_v38 }
 0x438   : > { %836 = vadd.xlane.f32.xlu1 %v835_v45 }
 0x439   : > { %v827_v47 = vsub.f32 %v804_v26, %v823_v42  ;;  %v838_v48 = vsel %vm663_vm5, %v830_v46, 0.0 }
 0x43a   : > { %839 = vadd.xlane.f32.xlu0 %v838_v48 }
 0x43b   : > { %v831_v49 = vmul.f32 %v827_v47, %v827_v47 }
 0x43d   : > { %v841_v51 = vsel %vm663_vm5, %v831_v49, 0.0 }
 0x43e   : > { %842 = vadd.xlane.f32.xlu1 %v841_v51 }
 0x4c3   : > { %v834_v54 = vpop.xlane.xlu0 %833 }
 0x4c4   : > { %v844_v55 = vmul.f32 0.03125, %v834_v54 }
 0x4c5   : > { %v837_v56 = vpop.xlane.xlu1 %836 }
 0x4c6   : > { %v848_v57 = vadd.f32 1e-05, %v844_v55  ;;  %v845_v58 = vmul.f32 0.03125, %v837_v56 }
 0x4c7   : > { %v840_v59 = vpop.xlane.xlu0 %839 }
 0x4c8   : > { %1283 = vrsqrt.f32 %v848_v57  ;;  %v849_v60 = vadd.f32 1e-05, %v845_v58  ;;  %v846_v13 = vmul.f32 0.03125, %v840_v59 }
 0x4ca   : > { %1285 = vrsqrt.f32 %v849_v60  ;;  %v850_v62 = vadd.f32 1e-05, %v846_v13 }
 0x4cb   : > { %v843_v43 = vpop.xlane.xlu1 %842 }
 0x4cc   : > { %1287 = vrsqrt.f32 %v850_v62  ;;  %v847_v63 = vmul.f32 0.03125, %v843_v43 }
 0x4ce   : > { %v851_v1 = vadd.f32 1e-05, %v847_v63 }
 0x4d0   : > { %1289 = vrsqrt.f32 %v851_v1 }
 0x4d2   : > { %v1284_v3 = vpop.eup %1283 }
 0x4d3   : > { %v856_v4 = vmul.f32 %v1284_v3, %v824_v9 }
 0x4d4   : > { %v1286_v44 = vpop.eup %1285 }
 0x4d5   : > { %v857_v6 = vmul.f32 %v1286_v44, %v825_v35  ;;  %v864_v7 = vmul.f32 %v863_v2, %v856_v4 }
 0x4d6   : > { %v1288_v8 = vpop.eup %1287 }
 0x4d7   : > { %v865_v10 = vmul.f32 %v863_v2, %v857_v6  ;;  %v872_v14 = vadd.f32 %v871_v50, %v864_v7  ;;  %v858_v15 = vmul.f32 %v1288_v8, %v826_v38 }
 0x4d9   : > { %v873_v53 = vadd.f32 %v871_v50, %v865_v10  ;;  %v866_v61 = vmul.f32 %v863_v2, %v858_v15  ;;  %v876_v18 = vmax.f32 %v872_v14, 0.0 }
 0x4da   : > { %v1290_v16 = vpop.eup %1289 }
 0x4db   : > { %v877_v19 = vmax.f32 %v873_v53, 0.0  ;;  %v859_v20 = vmul.f32 %v1290_v16, %v827_v47  ;;  %v874_v11 = vadd.f32 %v871_v50, %v866_v61 }
 0x4dd   : > { %v1137_v31 = vpack.c.bf16 %v877_v19, %v876_v18  ;;  %v867_v21 = vmul.f32 %v863_v2, %v859_v20  ;;  %v878_v17 = vmax.f32 %v874_v11, 0.0 }
 0x4df   : > { %1138 = vmatprep.subr.bf16.mxu0 %v1137_v31  ;;  %v875_v34 = vadd.f32 %v871_v50, %v867_v21 }
 0x4e0   : > { %1140 = vmatpush3.bf16.msra.mxu0 %v1137_v31 }
 0x4e1   : > { %v879_v22 = vmax.f32 %v875_v34, 0.0 }
 0x4e3   : > { %v1141_v0 = vpack.c.bf16 %v879_v22, %v878_v17 }
 0x4e5   : > { %1142 = vmatprep.subr.bf16.mxu0 %v1141_v0 }
 0x4e6   : > { %1144 = vmatpush3.bf16.msra.mxu0 %v1141_v0 }
 0x4e9   : > { %1135 = vmatmul.mubr.msk.f32.vlgmr.msra.gmra.mrb[8].mxu0 %vm663_vm5, %v881_v23 }
 0x5bc   : > { %v1136_v5 = vpop.f32.mrb[8].mxu0 }
 0x5bd   : > { %964 = vst.msk [vmem:[%s245_s18 + $0x8] sm:$0xff] %vm663_vm5, %v1136_v5  ;;  %v954_v24 = vpop.f32.mrb[9].mxu0 }
 0x5be   : > { %963 = vst.msk [vmem:[%s245_s18] sm:$0xff] %vm663_vm5, %v954_v24 }
 0x5bf   : > { %1304 = shalt.err (!%p1301_p3)
}
 0x5c0   : > { %s1305_s13 = scalar_lea.hbm %s1627_s29, 256  ;;  %s1309_s16 = scalar_lea.hbm %s1678_s6, 512 }
 0x5c1   : > { %p1306_p4 = scmp.ne.s32.totalorder %s1627_s29, %s1305_s13  ;;  %p1310_p9 = scmp.lt.u32.totalorder %s1627_s29, %s1678_s6 }
 0x5c2   : > { %p1311_p10 = scmp.lt.u32.totalorder %s1309_s16, %s1305_s13  ;;  %p1313_p12 = scmp.lt.u32.totalorder %s1305_s13, %s1627_s29 }
 0x5c3   : > { %p1307_p7 = pnand %p1306_p4, %p1439_p5 }
 0x5c4   : > { %p1312_p11 = por %p1311_p10, %p1310_p9 }
 0x5c5   : > { %p1308_p8 = pneg %p1307_p7 }
 0x5c6   : > { %p1314_p13 = por %p1313_p12, %p1312_p11 }
 0x5c8   : > { %p1315_p0 = pnand %p1314_p13, %p1308_p8 }
 0x5ca   : > { %1318 = shalt.err (!%p1315_p0)
}
 0x5cb   : > { %s1364_s20 = smov 128   ;;  %s1365_s26 = smov 8  }
 0x5cc   : > { %1145 = dma.vmem_to_hbm [thread:$0]  (%p1439_p5), %s1622_s19, 256, %s1627_s29, %s1631_s9, %s1364_s20, %s1364_s20, %s1365_s26  }
 0x5cd PF: > { %p1151_p1 = scmp.ge.s32.totalorder %s1353_s24, 2  ;;  %s994_s28 = sand.u32 1, %s1341_s21  }
 0x5ce   : > { %s995_s10 = scalar_lea.sflag [#allocation5], %s994_s28 }
 0x5cf   : > { %p1148_p2 = pnand %p1151_p1, %p1443_p6 }
 0x5d1   : > { %1336 = dma.done.wait (!%p1148_p2), %s995_s10, 256  }
 0x5d2   : > { %1338 = vsyncadd (!%p1148_p2), %s995_s10, 4294967040  ;;  %p16_p3 = scmp.ge.s32.totalorder %s1426_s27, 4   ;;  %s1681_s21 = smov %s1345_s22 }
 0x5d3   : > { %s1682_s22 = smov %s1349_s23  ;;  %s1683_s23 = smov %s1437_s30 }
 0x5d4   : > { %s1684_s24 = smov %s1426_s27  ;;  %18 = sbr.rel (!%p16_p3) target bundleno = 3 (0x3), region = 79 }
 0x5db   :  { %1000 = vsyncpa [#allocation5], 1 }
 0x5dc   :  { %1002 = vsyncpa [#allocation5 + $0x1], 1 }

</bundles_post_ra>
